<compile_context>
chip_gen: v5e
topology: v5e:2x2
jax: 0.10.0
libtpu: 0.0.40
codegen_flags: <defaults>
</compile_context>

<pallas_src>
import functools

import numpy as np
import jax
import jax.numpy as jnp
from jax.experimental import pallas as pl
from jax.experimental.pallas import tpu as pltpu


def _round_up(x, m):
    return (x + m - 1) // m * m


def _default_vmem_limit():
    """Generation-aware VMEM budget (v5e/v6e: 128 MiB, v7x: 64 MiB)."""
    try:
        cap = int(pltpu.get_tpu_info().vmem_capacity_bytes)
    except Exception:
        cap = 128 * 1024 * 1024
    return max(32 * 1024 * 1024, min(int(cap * 0.7), 96 * 1024 * 1024))


_VMEM_LIMIT = _default_vmem_limit()


def _lane_tile(p):
    """Tile for a 128-aligned lane-dim extent p."""
    if p % 512 == 0:
        return 512
    if p % 256 == 0:
        return 256
    return 128


# --------------------------------------------------------------------------
# Tiled GEMM kernels (bf16 operands, f32 VMEM scratch accumulator, bf16 out)
# --------------------------------------------------------------------------
def _matmul_affine_kernel(a_ref, b_ref, s_ref, c_ref, o_ref, acc_ref, *,
                          relu, nk):
    k = pl.program_id(2)

    @pl.when(k == 0)
    def _():
        acc_ref[...] = jnp.zeros_like(acc_ref)

    acc_ref[...] += jnp.dot(a_ref[...], b_ref[...],
                            preferred_element_type=jnp.float32)

    @pl.when(k == nk - 1)
    def _():
        r = acc_ref[...] * s_ref[...] + c_ref[...]
        if relu:
            r = jnp.maximum(r, 0.0)
        o_ref[...] = r.astype(o_ref.dtype)


def _matmul_affine_res_kernel(a_ref, b_ref, s_ref, c_ref, r_ref, o_ref,
                              acc_ref, *, relu, nk):
    k = pl.program_id(2)

    @pl.when(k == 0)
    def _():
        acc_ref[...] = jnp.zeros_like(acc_ref)

    acc_ref[...] += jnp.dot(a_ref[...], b_ref[...],
                            preferred_element_type=jnp.float32)

    @pl.when(k == nk - 1)
    def _():
        r = acc_ref[...] * s_ref[...] + c_ref[...] + r_ref[...].astype(jnp.float32)
        if relu:
            r = jnp.maximum(r, 0.0)
        o_ref[...] = r.astype(o_ref.dtype)


def _matmul_plain_kernel(a_ref, b_ref, o_ref):
    k = pl.program_id(2)

    @pl.when(k == 0)
    def _():
        o_ref[...] = jnp.zeros_like(o_ref)

    o_ref[...] += jnp.dot(a_ref[...], b_ref[...],
                          preferred_element_type=jnp.float32)


def _pick_tiles(M, K, N):
    """Tile sizes bounded in VMEM, favouring large (<=512) MXU-friendly tiles."""
    Np = _round_up(N, 128)
    TN = _lane_tile(Np)
    Kp = _round_up(K, 128)
    TK = _lane_tile(Kp)
    Mp = _round_up(M, 16)          # bf16 sublane packing
    if Mp > 512:
        TM = 512
        Mp = _round_up(M, TM)
    else:
        TM = Mp
    return Mp, TM, Kp, TK, Np, TN


@functools.lru_cache(maxsize=None)
def _get_matmul(Mp, Kp, Np, TM, TK, TN, relu, affine, residual, out_f32):
    nk = Kp // TK
    grid = (Mp // TM, Np // TN, nk)
    a_spec = pl.BlockSpec((TM, TK), lambda i, j, k: (i, k))
    b_spec = pl.BlockSpec((TK, TN), lambda i, j, k: (k, j))
    o_spec = pl.BlockSpec((TM, TN), lambda i, j, k: (i, j))
    v_spec = pl.BlockSpec((1, TN), lambda i, j, k: (0, j))
    if affine:
        in_specs = [a_spec, b_spec, v_spec, v_spec]
        if residual:
            in_specs.append(pl.BlockSpec((TM, TN), lambda i, j, k: (i, j)))
            kernel = functools.partial(_matmul_affine_res_kernel,
                                       relu=relu, nk=nk)
        else:
            kernel = functools.partial(_matmul_affine_kernel,
                                       relu=relu, nk=nk)
        out_dtype = jnp.float32 if out_f32 else jnp.bfloat16
        scratch = [pltpu.VMEM((TM, TN), jnp.float32)]
    else:
        kernel = _matmul_plain_kernel
        in_specs = [a_spec, b_spec]
        out_dtype = jnp.float32
        scratch = []
    f = pl.pallas_call(
        kernel,
        out_shape=jax.ShapeDtypeStruct((Mp, Np), out_dtype),
        grid_spec=pltpu.PrefetchScalarGridSpec(
            num_scalar_prefetch=0,
            grid=grid,
            in_specs=in_specs,
            out_specs=o_spec,
            scratch_shapes=scratch),
        compiler_params=pltpu.CompilerParams(
            dimension_semantics=("parallel", "parallel", "arbitrary"),
            vmem_limit_bytes=_VMEM_LIMIT),
    )
    return jax.jit(f)


def matmul_fused(a, b, scale=None, bias=None, relu=False, residual=None,
                 out_f32=False):
    """(M,K)@(K,N) [* scale[N] + bias[N] (+ residual)] [+ReLU]."""
    M, K = a.shape
    _, N = b.shape
    Mp, TM, Kp, TK, Np, TN = _pick_tiles(M, K, N)
    a = a.astype(jnp.bfloat16)
    b = b.astype(jnp.bfloat16)
    if (Mp, Kp) != (M, K):
        a = jnp.pad(a, ((0, Mp - M), (0, Kp - K)))
    if (Kp, Np) != (K, N):
        b = jnp.pad(b, ((0, Kp - K), (0, Np - N)))
    affine = scale is not None
    if affine:
        s = jnp.asarray(scale, jnp.float32)
        c = jnp.asarray(bias, jnp.float32)
        if Np != N:
            s = jnp.pad(s, (0, Np - N))
            c = jnp.pad(c, (0, Np - N))
        args = [a, b, s.reshape(1, Np), c.reshape(1, Np)]
        has_res = residual is not None
        if has_res:
            r = residual.astype(jnp.bfloat16)
            if (Mp, Np) != r.shape:
                r = jnp.pad(r, ((0, Mp - M), (0, Np - N)))
            args.append(r)
        out = _get_matmul(Mp, Kp, Np, TM, TK, TN, bool(relu), True, has_res,
                          bool(out_f32))(*args)
    else:
        out = _get_matmul(Mp, Kp, Np, TM, TK, TN, False, False, False,
                          True)(a, b)
    if (Mp, Np) != (M, N):
        out = out[:M, :N]
    return out


# --------------------------------------------------------------------------
# Implicit-GEMM 3x3 stride-1 convolution (no im2col materialisation).
# Input and output live on the same zero-padded flattened spatial grid; each
# tap is a constant row offset handled with an in-kernel pl.ds slice of a
# halo-padded block.  Border rows of the output are garbage and are sliced
# away by the wrapper.
# --------------------------------------------------------------------------
def _conv3x3_kernel(a_ref, b_ref, s_ref, c_ref, o_ref, acc_ref, *,
                    offs, halo, m, relu, nk):
    k = pl.program_id(2)

    @pl.when(k == 0)
    def _():
        acc_ref[...] = jnp.zeros_like(acc_ref)

    for t, off in enumerate(offs):
        a_t = a_ref[0, pl.ds(halo + off, m), :]
        acc_ref[...] += jnp.dot(a_t, b_ref[t],
                                preferred_element_type=jnp.float32)

    @pl.when(k == nk - 1)
    def _():
        r = acc_ref[...] * s_ref[...] + c_ref[...]
        if relu:
            r = jnp.maximum(r, 0.0)
        o_ref[0] = r.astype(o_ref.dtype)


@functools.lru_cache(maxsize=None)
def _get_conv3x3(N, Mtot, Mp8, Kp, Np, TK, TN, halo, offs, relu):
    nk = Kp // TK
    grid = (N, Np // TN, nk)
    kernel = functools.partial(_conv3x3_kernel, offs=offs, halo=halo,
                               m=Mp8, relu=relu, nk=nk)
    f = pl.pallas_call(
        kernel,
        out_shape=jax.ShapeDtypeStruct((N, Mp8, Np), jnp.bfloat16),
        grid_spec=pltpu.PrefetchScalarGridSpec(
            num_scalar_prefetch=0,
            grid=grid,
            in_specs=[pl.BlockSpec((1, Mtot, TK), lambda n, j, k: (n, 0, k)),
                      pl.BlockSpec((9, TK, TN), lambda n, j, k: (0, k, j)),
                      pl.BlockSpec((1, TN), lambda n, j, k: (0, j)),
                      pl.BlockSpec((1, TN), lambda n, j, k: (0, j))],
            out_specs=pl.BlockSpec((1, Mp8, TN), lambda n, j, k: (n, 0, j)),
            scratch_shapes=[pltpu.VMEM((Mp8, TN), jnp.float32)]),
        compiler_params=pltpu.CompilerParams(
            dimension_semantics=("parallel", "parallel", "arbitrary"),
            vmem_limit_bytes=_VMEM_LIMIT),
    )
    return jax.jit(f)


def _conv3x3_dims(H, W, Cin, Cout, d):
    Hp, Wp = H + 2 * d, W + 2 * d
    M = Hp * Wp
    Mp8 = _round_up(M, 8)
    halo = d * Wp + d
    Mtot = _round_up(Mp8 + 2 * halo, 8)
    Kp = _round_up(Cin, 128)
    TK = min(_lane_tile(Kp), 256)
    Np = _round_up(Cout, 128)
    TN = min(_lane_tile(Np), 256)
    return Hp, Wp, M, Mp8, halo, Mtot, Kp, TK, Np, TN


def _conv3x3_vmem_ok(H, W, Cin, Cout, d):
    _, _, _, Mp8, _, Mtot, _, TK, _, TN = _conv3x3_dims(H, W, Cin, Cout, d)
    a_bytes = Mtot * TK * 2 * 2          # double-buffered input block
    b_bytes = 9 * TK * TN * 2 * 2        # double-buffered weight block
    acc_bytes = Mp8 * TN * 4             # f32 scratch accumulator
    out_bytes = Mp8 * TN * 2 * 2         # double-buffered bf16 output block
    tmp_bytes = Mp8 * TK * 2 * 2         # per-tap slice temporaries
    total = a_bytes + b_bytes + acc_bytes + out_bytes + tmp_bytes
    return total <= min(_VMEM_LIMIT // 2, 28 * 1024 * 1024)


def _conv3x3_direct(x, w, scale, bias, dilation, relu):
    """3x3 conv, stride 1, padding == dilation, fused BN affine + ReLU."""
    N, H, W, Cin = x.shape
    Cout = w.shape[0]
    d = dilation
    Hp, Wp, M, Mp8, halo, Mtot, Kp, TK, Np, TN = _conv3x3_dims(
        H, W, Cin, Cout, d)
    xp = jnp.pad(x.astype(jnp.bfloat16), ((0, 0), (d, d), (d, d), (0, 0)))
    a = xp.reshape(N, M, Cin)
    a = jnp.pad(a, ((0, 0), (halo, Mtot - M - halo), (0, Kp - Cin)))
    b = jnp.transpose(w, (2, 3, 1, 0)).reshape(9, Cin, Cout).astype(jnp.bfloat16)
    b = jnp.pad(b, ((0, 0), (0, Kp - Cin), (0, Np - Cout)))
    s = jnp.asarray(scale, jnp.float32)
    c = jnp.asarray(bias, jnp.float32)
    if Np != Cout:
        s = jnp.pad(s, (0, Np - Cout))
        c = jnp.pad(c, (0, Np - Cout))
    offs = tuple((i - 1) * d * Wp + (j - 1) * d
                 for i in range(3) for j in range(3))
    out = _get_conv3x3(N, Mtot, Mp8, Kp, Np, TK, TN, halo, offs, bool(relu))(
        a, b, s.reshape(1, Np), c.reshape(1, Np))
    out = out[:, :M, :Cout].reshape(N, Hp, Wp, Cout)[:, d:d + H, d:d + W, :]
    return out


# --------------------------------------------------------------------------
# 3x3 / stride-2 max pool (bf16, no 9x im2col materialization)
# --------------------------------------------------------------------------
def _maxpool9_kernel(a_lo, a_hi, b_lo, b_hi, c_lo, c_hi, o_ref):
    m = a_lo[0, 0]
    for ref, row in ((a_lo, 1), (a_hi, 0),
                     (b_lo, 0), (b_lo, 1), (b_hi, 0),
                     (c_lo, 0), (c_lo, 1), (c_hi, 0)):
        m = jnp.maximum(m, ref[0, row])
    o_ref[0, 0] = m


@functools.lru_cache(maxsize=None)
def _get_maxpool(N, Ho, Wo, C):
    blk = (1, 2, Wo, C)
    lo = pl.BlockSpec(blk, lambda n, r: (n, r, 0, 0))       # rows 2r, 2r+1
    hi = pl.BlockSpec(blk, lambda n, r: (n, r + 1, 0, 0))   # rows 2r+2, 2r+3
    return jax.jit(pl.pallas_call(
        _maxpool9_kernel,
        out_shape=jax.ShapeDtypeStruct((N, Ho, Wo, C), jnp.bfloat16),
        grid_spec=pltpu.PrefetchScalarGridSpec(
            num_scalar_prefetch=0,
            grid=(N, Ho),
            in_specs=[lo, hi, lo, hi, lo, hi],
            out_specs=pl.BlockSpec((1, 1, Wo, C), lambda n, r: (n, r, 0, 0))),
        compiler_params=pltpu.CompilerParams(
            dimension_semantics=("parallel", "parallel"),
            vmem_limit_bytes=_VMEM_LIMIT),
    ))


def max_pool_3x3_s2(x):
    """MaxPool2d(kernel=3, stride=2, padding=1)."""
    N, H, W, C = x.shape
    Ho = (H - 1) // 2 + 1
    Wo = (W - 1) // 2 + 1
    Hp = 2 * Ho + 2
    Wp = 2 * Wo + 2
    xp = jnp.pad(x.astype(jnp.bfloat16),
                 ((0, 0), (1, Hp - H - 1), (1, Wp - W - 1), (0, 0)),
                 constant_values=-jnp.inf)
    a = xp[:, :, 0:2 * Wo:2, :]
    b = xp[:, :, 1:2 * Wo + 1:2, :]
    c = xp[:, :, 2:2 * Wo + 2:2, :]
    return _get_maxpool(N, Ho, Wo, C)(a, a, b, b, c, c)


# --------------------------------------------------------------------------
# Global average pool (tiled sum-reduce, bf16 in / f32 accumulate)
# --------------------------------------------------------------------------
def _mean_kernel(x_ref, o_ref, *, nt, inv):
    t = pl.program_id(1)

    @pl.when(t == 0)
    def _():
        o_ref[...] = jnp.zeros_like(o_ref)

    o_ref[...] += jnp.sum(x_ref[...].astype(jnp.float32), axis=1,
                          keepdims=True)

    @pl.when(t == nt - 1)
    def _():
        o_ref[...] = o_ref[...] * inv


@functools.lru_cache(maxsize=None)
def _get_mean(N, HWp, C, T, inv):
    nt = HWp // T
    kernel = functools.partial(_mean_kernel, nt=nt, inv=inv)
    return jax.jit(pl.pallas_call(
        kernel,
        out_shape=jax.ShapeDtypeStruct((N, 1, C), jnp.float32),
        grid_spec=pltpu.PrefetchScalarGridSpec(
            num_scalar_prefetch=0,
            grid=(N, nt),
            in_specs=[pl.BlockSpec((1, T, C), lambda n, t: (n, t, 0))],
            out_specs=pl.BlockSpec((1, 1, C), lambda n, t: (n, 0, 0))),
        compiler_params=pltpu.CompilerParams(
            dimension_semantics=("parallel", "arbitrary"),
            vmem_limit_bytes=_VMEM_LIMIT),
    ))


def global_avg_pool(x):
    N, H, W, C = x.shape
    HW = H * W
    x2 = x.reshape(N, HW, C).astype(jnp.bfloat16)
    T = max(8, min(2048, _round_up((2 * 1024 * 1024) // (2 * C), 8)))
    if HW <= T:
        T = _round_up(HW, 8)
    HWp = _round_up(HW, T)
    if HWp != HW:
        x2 = jnp.pad(x2, ((0, 0), (0, HWp - HW), (0, 0)))
    out = _get_mean(N, HWp, C, T, 1.0 / HW)(x2)
    return out.reshape(N, C)


# --------------------------------------------------------------------------
# Conv wrappers
# --------------------------------------------------------------------------
def _im2col(x, kh, kw, stride, dilation, padding):
    N, H, W, C = x.shape
    Ho = (H + 2 * padding - dilation * (kh - 1) - 1) // stride + 1
    Wo = (W + 2 * padding - dilation * (kw - 1) - 1) // stride + 1
    if padding:
        x = jnp.pad(x, ((0, 0), (padding, padding), (padding, padding), (0, 0)))
    if kh == 1 and kw == 1 and stride == 1:
        return x.reshape(N * Ho * Wo, C), (N, Ho, Wo)
    patches = []
    for i in range(kh):
        for j in range(kw):
            patches.append(
                x[:, i * dilation: i * dilation + (Ho - 1) * stride + 1: stride,
                     j * dilation: j * dilation + (Wo - 1) * stride + 1: stride, :])
    cols = jnp.concatenate(patches, axis=-1)
    return cols.reshape(N * Ho * Wo, kh * kw * C), (N, Ho, Wo)


def conv_bn(x, w, scale, bias, *, stride=1, padding=0, dilation=1, relu=True,
            residual=None):
    """Conv2d (PyTorch OIHW weight) + folded-BN affine + optional ReLU
    (+ optional fused residual add before the ReLU)."""
    Cout, Cin, kh, kw = w.shape
    N, H, W, _ = x.shape
    # Exact shortcut: a 3x3 "same" conv whose non-centre taps can only ever
    # hit the zero padding collapses to a 1x1 conv (ASPP on small maps).
    if (kh == 3 and kw == 3 and stride == 1 and padding == dilation
            and dilation >= H and dilation >= W):
        w = w[:, :, 1:2, 1:2]
        kh = kw = 1
        padding = 0
        dilation = 1
    # Implicit-GEMM path for 3x3 / stride-1 / "same" convs (VMEM-gated).
    if (kh == 3 and kw == 3 and stride == 1 and padding == dilation
            and residual is None
            and _conv3x3_vmem_ok(H, W, Cin, Cout, dilation)):
        return _conv3x3_direct(x, w, scale, bias, dilation, relu)
    cols, (N2, Ho, Wo) = _im2col(x.astype(jnp.bfloat16), kh, kw,
                                 stride, dilation, padding)
    wmat = jnp.transpose(w, (2, 3, 1, 0)).reshape(kh * kw * Cin, Cout)
    res2 = None
    if residual is not None:
        res2 = residual.reshape(N2 * Ho * Wo, Cout)
    out = matmul_fused(cols, wmat, scale, bias, relu, residual=res2)
    return out.reshape(N2, Ho, Wo, Cout)


def _interp_matrix(in_size, out_size):
    """PyTorch bilinear (align_corners=False) interpolation matrix."""
    m = np.zeros((out_size, in_size), dtype=np.float32)
    scale = in_size / out_size
    for o in range(out_size):
        src = (o + 0.5) * scale - 0.5
        src = max(src, 0.0)
        i0 = min(int(np.floor(src)), in_size - 1)
        i1 = min(i0 + 1, in_size - 1)
        w1 = src - i0
        m[o, i0] += 1.0 - w1
        m[o, i1] += w1
    return m


def bilinear_resize(x, out_h, out_w):
    """Separable bilinear upsample as two Pallas GEMMs.  x: NHWC."""
    N, H, W, C = x.shape
    MH = jnp.asarray(_interp_matrix(H, out_h))
    MW = jnp.asarray(_interp_matrix(W, out_w))
    xr = jnp.transpose(x, (1, 0, 2, 3)).reshape(H, N * W * C)
    y = matmul_fused(MH, xr)
    y = jnp.transpose(y.reshape(out_h, N, W, C), (1, 0, 2, 3))
    yc = jnp.transpose(y, (2, 0, 1, 3)).reshape(W, N * out_h * C)
    z = matmul_fused(MW, yc)
    z = jnp.transpose(z.reshape(out_w, N, out_h, C), (1, 2, 0, 3))
    return z


# --------------------------------------------------------------------------
# Deterministic parameter construction (DeepLabV3-ResNet101 shapes)
# --------------------------------------------------------------------------
class _KeyGen:
    def __init__(self, seed):
        self._key = jax.random.PRNGKey(seed)

    def __call__(self):
        self._key, sub = jax.random.split(self._key)
        return sub


def _make_conv_bn_params(kg, cin, cout, k):
    fan_in = cin * k * k
    w = jax.random.normal(kg(), (cout, cin, k, k), jnp.float32) * np.sqrt(2.0 / fan_in)
    gamma = jax.random.uniform(kg(), (cout,), jnp.float32, 0.8, 1.2)
    beta = 0.05 * jax.random.normal(kg(), (cout,), jnp.float32)
    rmean = 0.05 * jax.random.normal(kg(), (cout,), jnp.float32)
    rvar = jax.random.uniform(kg(), (cout,), jnp.float32, 0.8, 1.2)
    scale = gamma / jnp.sqrt(rvar + 1e-5)
    bias = beta - rmean * scale
    return {"w": w, "scale": scale, "bias": bias}


def _make_bottleneck_params(kg, inplanes, planes, stride, dilation, downsample):
    p = {
        "conv1": _make_conv_bn_params(kg, inplanes, planes, 1),
        "conv2": _make_conv_bn_params(kg, planes, planes, 3),
        "conv3": _make_conv_bn_params(kg, planes, planes * 4, 1),
        "stride": stride,
        "dilation": dilation,
    }
    if downsample:
        p["downsample"] = _make_conv_bn_params(kg, inplanes, planes * 4, 1)
    return p


def make_params(num_classes, size, seed=0):
    kg = _KeyGen(seed)
    params = {"stem": _make_conv_bn_params(kg, 3, 64, 7)}

    # ResNet-101, replace_stride_with_dilation=[False, True, True]
    layers_cfg = [(64, 3, 1, False), (128, 4, 2, False),
                  (256, 23, 1, True), (512, 3, 1, True)]
    inplanes, dilation = 64, 1
    layers = []
    for planes, blocks, stride, dilate in layers_cfg:
        prev_dilation = dilation
        if dilate:
            dilation *= stride
            stride = 1
        downsample = (stride != 1) or (inplanes != planes * 4)
        blocks_p = [_make_bottleneck_params(kg, inplanes, planes, stride,
                                            prev_dilation, downsample)]
        inplanes = planes * 4
        for _ in range(1, blocks):
            blocks_p.append(_make_bottleneck_params(kg, inplanes, planes, 1,
                                                    dilation, False))
        layers.append(blocks_p)
    params["layers"] = layers

    # DeepLabHead: ASPP(2048, [12, 24, 36]) -> 3x3 conv/BN/ReLU -> 1x1 conv
    params["aspp"] = {
        "b0": _make_conv_bn_params(kg, 2048, 256, 1),
        "b1": _make_conv_bn_params(kg, 2048, 256, 3),
        "b2": _make_conv_bn_params(kg, 2048, 256, 3),
        "b3": _make_conv_bn_params(kg, 2048, 256, 3),
        "pool": _make_conv_bn_params(kg, 2048, 256, 1),
        "project": _make_conv_bn_params(kg, 5 * 256, 256, 1),
    }
    params["head_conv"] = _make_conv_bn_params(kg, 256, 256, 3)
    # classifier[4] replaced with Conv2d(size, num_classes, 1, 1) (with bias).
    params["final_w"] = jax.random.normal(
        kg(), (num_classes, size, 1, 1), jnp.float32) * np.sqrt(1.0 / size)
    params["final_b"] = 0.01 * jax.random.normal(kg(), (num_classes,), jnp.float32)
    return params


# --------------------------------------------------------------------------
# Forward pass
# --------------------------------------------------------------------------
def bottleneck_forward(x, p):
    stride, dilation = p["stride"], p["dilation"]
    out = conv_bn(x, **p["conv1"], relu=True)
    out = conv_bn(out, **p["conv2"], stride=stride, padding=dilation,
                  dilation=dilation, relu=True)
    if "downsample" in p:
        identity = conv_bn(x, **p["downsample"], stride=stride, relu=False)
    else:
        identity = x
    # Residual add + ReLU fused into the conv3 GEMM epilogue.
    return conv_bn(out, **p["conv3"], relu=True, residual=identity)


def backbone_forward(x, params):
    x = conv_bn(x, **params["stem"], stride=2, padding=3, relu=True)
    x = max_pool_3x3_s2(x)
    for layer in params["layers"]:
        for block in layer:
            x = bottleneck_forward(x, block)
    return x  # "out" feature map (stride 8: H/8 x W/8 x 2048)


def classifier_forward(x, params):
    N, H, W, C = x.shape
    aspp = params["aspp"]
    branches = [conv_bn(x, **aspp["b0"], relu=True)]
    for name, rate in (("b1", 12), ("b2", 24), ("b3", 36)):
        branches.append(conv_bn(x, **aspp[name], padding=rate,
                                dilation=rate, relu=True))
    # ASPPPooling: global average pool -> 1x1 conv/BN/ReLU -> upsample (const)
    gap = global_avg_pool(x).reshape(N, 1, 1, C)
    pooled = conv_bn(gap, **aspp["pool"], relu=True)
    branches.append(jnp.broadcast_to(pooled, (N, H, W, pooled.shape[-1])))
    cat = jnp.concatenate(branches, axis=-1)                  # (N,H,W,1280)
    y = conv_bn(cat, **aspp["project"], relu=True)
    # Dropout(0.5) == identity in eval mode.
    y = conv_bn(y, **params["head_conv"], padding=1, relu=True)
    # replaced classifier[4]: Conv2d(size, num_classes, 1) with bias
    w = params["final_w"]
    num_classes = w.shape[0]
    cols = y.reshape(N * H * W, y.shape[-1]).astype(jnp.bfloat16)
    wmat = jnp.transpose(w, (2, 3, 1, 0)).reshape(-1, num_classes)
    out = matmul_fused(cols, wmat, jnp.ones((num_classes,), jnp.float32),
                       params["final_b"], relu=False, out_f32=True)
    return out.reshape(N, H, W, num_classes)


def deeplabv3_resnet101_forward(params, x_nchw):
    x = jnp.transpose(jnp.asarray(x_nchw, jnp.float32), (0, 2, 3, 1))  # NHWC
    x = x.astype(jnp.bfloat16)
    in_h, in_w = x.shape[1], x.shape[2]
    feat = backbone_forward(x, params)
    logits = classifier_forward(feat, params)
    out = bilinear_resize(logits, in_h, in_w)
    return {"out": jnp.transpose(out, (0, 3, 1, 2))}  # back to NCHW


if __name__ == "__main__":
    num_classes, size = 21, 256
    params = make_params(num_classes, size, seed=0)
    x = jax.random.normal(jax.random.PRNGKey(0), (2, 3, 16, 16), jnp.float32)
    result = deeplabv3_resnet101_forward(params, x)
    out = jax.block_until_ready(result["out"])
    assert out.shape == (2, num_classes, 16, 16), out.shape
    assert bool(jnp.all(jnp.isfinite(out)))
    print("KERNEL_OK")
</pallas_src>

<mosaic_0001>
module attributes {stable_mosaic.version = 11 : i64} {
  func.func @_matmul_affine_kernel(%arg0: i32, %arg1: i32, %arg2: i32, %arg3: memref<128x256xbf16, #tpu.memory_space<vmem>>, %arg4: memref<256x128xbf16, #tpu.memory_space<vmem>>, %arg5: memref<1x128xf32, #tpu.memory_space<vmem>>, %arg6: memref<1x128xf32, #tpu.memory_space<vmem>>, %arg7: memref<128x128xbf16, #tpu.memory_space<vmem>>, %arg8: memref<128x128xf32, #tpu.memory_space<vmem>>) attributes {dimension_semantics = [#tpu.dimension_semantics<parallel>, #tpu.dimension_semantics<parallel>, #tpu.dimension_semantics<arbitrary>], iteration_bounds = array<i64: 1, 1, 1>, scalar_prefetch = 0 : i64, scratch_operands = 1 : i64, tpu.core_type = #tpu.core_type<tc>, window_params = [{transform_indices = @transform_0, window_bounds = array<i64: 128, 256>}, {transform_indices = @transform_1, window_bounds = array<i64: 256, 128>}, {transform_indices = @transform_2, window_bounds = array<i64: 1, 128>}, {transform_indices = @transform_3, window_bounds = array<i64: 1, 128>}, {transform_indices = @transform_4, window_bounds = array<i64: 128, 128>}]} {
    %c0_i32 = arith.constant 0 : i32
    %0 = arith.cmpi eq, %arg2, %c0_i32 : i32
    %1 = arith.extui %0 : i1 to i32
    %c0_i32_0 = arith.constant 0 : i32
    %2 = arith.cmpi ne, %1, %c0_i32_0 : i32
    scf.if %2 {
      %cst_10 = arith.constant 0.000000e+00 : f32
      %12 = vector.broadcast %cst_10 : f32 to vector<128x128xf32>
      %c0_11 = arith.constant 0 : index
      %c0_12 = arith.constant 0 : index
      %13 = vector.load %arg8[%c0_11, %c0_12] : memref<128x128xf32, #tpu.memory_space<vmem>>, vector<128x128xf32>
      tpu.vector_store %arg8[%c0_11, %c0_12], %12 {strides = array<i32>} : memref<128x128xf32, #tpu.memory_space<vmem>>, vector<128x128xf32>,
    } else {
    }
    %c0 = arith.constant 0 : index
    %c0_1 = arith.constant 0 : index
    %3 = vector.load %arg8[%c0, %c0_1] : memref<128x128xf32, #tpu.memory_space<vmem>>, vector<128x128xf32>
    %c0_2 = arith.constant 0 : index
    %c0_3 = arith.constant 0 : index
    %4 = vector.load %arg3[%c0_2, %c0_3] : memref<128x256xbf16, #tpu.memory_space<vmem>>, vector<128x256xbf16>
    %c0_4 = arith.constant 0 : index
    %c0_5 = arith.constant 0 : index
    %5 = vector.load %arg4[%c0_4, %c0_5] : memref<256x128xbf16, #tpu.memory_space<vmem>>, vector<256x128xbf16>
    %cst = arith.constant dense<0.000000e+00> : vector<128x128xf32>
    %6 = tpu.matmul %4, %5, %cst {dimension_numbers = #tpu.dot_dimension_numbers<[1], [0], [0], [1], [0, 0, 1, 1], [], []>} : vector<128x256xbf16>, vector<256x128xbf16>, vector<128x128xf32> -> vector<128x128xf32>
    %7 = arith.addf %3, %6 : vector<128x128xf32>
    %c0_6 = arith.constant 0 : index
    %c0_7 = arith.constant 0 : index
    %8 = vector.load %arg8[%c0_6, %c0_7] : memref<128x128xf32, #tpu.memory_space<vmem>>, vector<128x128xf32>
    tpu.vector_store %arg8[%c0_6, %c0_7], %7 {strides = array<i32>} : memref<128x128xf32, #tpu.memory_space<vmem>>, vector<128x128xf32>,
    %c0_i32_8 = arith.constant 0 : i32
    %9 = arith.cmpi eq, %arg2, %c0_i32_8 : i32
    %10 = arith.extui %9 : i1 to i32
    %c0_i32_9 = arith.constant 0 : i32
    %11 = arith.cmpi ne, %10, %c0_i32_9 : i32
    scf.if %11 {
      %c0_10 = arith.constant 0 : index
      %c0_11 = arith.constant 0 : index
      %12 = vector.load %arg8[%c0_10, %c0_11] : memref<128x128xf32, #tpu.memory_space<vmem>>, vector<128x128xf32>
      %c0_12 = arith.constant 0 : index
      %c0_13 = arith.constant 0 : index
      %13 = vector.load %arg5[%c0_12, %c0_13] : memref<1x128xf32, #tpu.memory_space<vmem>>, vector<1x128xf32>
      %14 = vector.broadcast %13 : vector<1x128xf32> to vector<128x128xf32>
      %15 = arith.mulf %12, %14 : vector<128x128xf32>
      %c0_14 = arith.constant 0 : index
      %c0_15 = arith.constant 0 : index
      %16 = vector.load %arg6[%c0_14, %c0_15] : memref<1x128xf32, #tpu.memory_space<vmem>>, vector<1x128xf32>
      %17 = vector.broadcast %16 : vector<1x128xf32> to vector<128x128xf32>
      %18 = arith.addf %15, %17 : vector<128x128xf32>
      %cst_16 = arith.constant 0.000000e+00 : f32
      %19 = vector.broadcast %cst_16 : f32 to vector<128x128xf32>
      %20 = arith.maximumf %18, %19 : vector<128x128xf32>
      %21 = arith.truncf %20 : vector<128x128xf32> to vector<128x128xbf16>
      %c0_17 = arith.constant 0 : index
      %c0_18 = arith.constant 0 : index
      %22 = vector.load %arg7[%c0_17, %c0_18] : memref<128x128xbf16, #tpu.memory_space<vmem>>, vector<128x128xbf16>
      tpu.vector_store %arg7[%c0_17, %c0_18], %21 {strides = array<i32>} : memref<128x128xbf16, #tpu.memory_space<vmem>>, vector<128x128xbf16>,
    } else {
    }
    return
  }
  func.func @transform_0(%arg0: i32, %arg1: i32, %arg2: i32) -> (i32, i32) {
    %c0_i32 = arith.constant 0 : i32
    return %arg0, %arg2 : i32, i32
  }
  func.func @transform_1(%arg0: i32, %arg1: i32, %arg2: i32) -> (i32, i32) {
    %c0_i32 = arith.constant 0 : i32
    return %arg2, %arg1 : i32, i32
  }
  func.func @transform_2(%arg0: i32, %arg1: i32, %arg2: i32) -> (i32, i32) {
    %c0_i32 = arith.constant 0 : i32
    %c0_i32_0 = arith.constant 0 : i32
    return %c0_i32, %arg1 : i32, i32
  }
  func.func @transform_3(%arg0: i32, %arg1: i32, %arg2: i32) -> (i32, i32) {
    %c0_i32 = arith.constant 0 : i32
    %c0_i32_0 = arith.constant 0 : i32
    return %c0_i32, %arg1 : i32, i32
  }
  func.func @transform_4(%arg0: i32, %arg1: i32, %arg2: i32) -> (i32, i32) {
    %c0_i32 = arith.constant 0 : i32
    return %arg0, %arg1 : i32, i32
  }
}

</mosaic_0001>

<bundles_post_ra>
// kernel: tpu_custom_call.1
= control target key start
LH: loop header
LB: loop body
LE: loop exit
PB: predicated region body
PF: predicated region fallthrough
CT: control target
= control target key end

     0   :  { %9 = vsyncpa [#allocation4], 0  ;;  %s966_s0 = inlined_call_operand.hbm [shape: bf16[128,256], index: 0, kind: input, shape index: {}]   ;;  %s967_s1 = inlined_call_operand.hbm [shape: bf16[256,128], index: 1, kind: input, shape index: {}]   ;;  %s968_s2 = inlined_call_operand.vmem [shape: f32[1,128], index: 2, kind: input, shape index: {}]   ;;  %s969_s3 = inlined_call_operand.vmem [shape: f32[1,128], index: 3, kind: input, shape index: {}]   ;;  %s970_s4 = inlined_call_operand.hbm [shape: bf16[128,128], index: 4, kind: output, shape index: {}]  }
   0x1   :  { %10 = vsyncpa [#allocation7], 0 }
   0x2   :  { %11 = vsyncpa [#allocation5], 0  ;;  %s16_s17 = sshll.u32 %s966_s0, 4  ;;  %s877_s18 = smov [#allocation3]   ;;  %s17_s17 = int_to_ptr.hbm [resolvable:$true] %s16_s17 }
   0x3   :  { %s18_s19 = sshll.u32 %s877_s18, 4  ;;  %s29_s22 = sshll.u32 %s967_s1, 4  ;;  %s19_s19 = int_to_ptr.vmem [resolvable:$true] %s18_s19  ;;  %s30_s22 = int_to_ptr.hbm [resolvable:$true] %s29_s22 }
   0x4   :  { %s878_s23 = smov 128   ;;  %s879_s24 = smov 8  }
   0x5   :  { %24 = dma.hbm_to_vmem [thread:$0]  %s17_s17, 2048, %s19_s19, [#allocation4], %s878_s23, %s878_s23, %s879_s24  }
   0x6   :  { %s880_s25 = smov [#allocation6]   ;;  %s881_s27 = smov 64  }
   0x7   :  { %s31_s26 = sshll.u32 %s880_s25, 4  ;;  %s882_s28 = smov 4   ;;  %s32_s26 = int_to_ptr.vmem [resolvable:$true] %s31_s26 }
   0x8   :  { %37 = dma.hbm_to_vmem [thread:$0]  %s30_s22, 2048, %s32_s26, [#allocation7], %s881_s27, %s881_s27, %s882_s28  }
   0x9   :  { %871 = dma.done.wait [#allocation4], 2048  }
   0xa   :  { %872 = vsyncadd [#allocation4], 4294965248 }
   0xb   :  { %873 = dma.done.wait [#allocation7], 2048  }
   0xc   :  { %874 = vsyncadd [#allocation7], 4294965248  ;;  %v718_v0 = vld [vmem:[#allocation6 + $0x38] sm:$0xff]  ;;  %v717_v2 = vld [vmem:[#allocation6 + $0x30] sm:$0xff]  ;;  %s553_s7 = sshll.u32 %s970_s4, 4  ;;  %s554_s7 = int_to_ptr.hbm [resolvable:$true] %s553_s7 }
   0xd   :  { %v726_v1 = vld [vmem:[#allocation6 + $0x78] sm:$0xff]  ;;  %310 = vmatpush.bf16.msra.mxu0 %v718_v0  ;;  %774 = vmatpush.bf16.msra.mxu2 %v718_v0  ;;  %v725_v3 = vld [vmem:[#allocation6 + $0x70] sm:$0xff]  ;;  %v716_v4 = vld [vmem:[#allocation6 + $0x28] sm:$0xff] }
   0xe   :  { %359 = vmatpush.bf16.msra.mxu1 %v726_v1  ;;  %782 = vmatpush.bf16.msra.mxu3 %v726_v1  ;;  %v724_v5 = vld [vmem:[#allocation6 + $0x68] sm:$0xff]  ;;  %v715_v6 = vld [vmem:[#allocation6 + $0x20] sm:$0xff]  ;;  %v714_v8 = vld [vmem:[#allocation6 + $0x18] sm:$0xff] }
   0xf   :  { %v723_v7 = vld [vmem:[#allocation6 + $0x60] sm:$0xff]  ;;  %v722_v9 = vld [vmem:[#allocation6 + $0x58] sm:$0xff]  ;;  %v713_v10 = vld [vmem:[#allocation6 + $0x10] sm:$0xff] }
  0x10   :  { %v721_v11 = vld [vmem:[#allocation6 + $0x50] sm:$0xff]  ;;  %v712_v12 = vld [vmem:[#allocation6 + $0x8] sm:$0xff]  ;;  %v711_v14 = vld [vmem:[#allocation6] sm:$0xff] }
  0x11   :  { %311 = vmatpush.bf16.msra.mxu0 %v717_v2  ;;  %775 = vmatpush.bf16.msra.mxu2 %v717_v2  ;;  %v720_v13 = vld [vmem:[#allocation6 + $0x48] sm:$0xff]  ;;  %v719_v15 = vld [vmem:[#allocation6 + $0x40] sm:$0xff]  ;;  %v577_v28 = vld [vmem:[#allocation3 + $0x10] sm:$0xf] }
  0x12   :  { %360 = vmatpush.bf16.msra.mxu1 %v725_v3  ;;  %783 = vmatpush.bf16.msra.mxu3 %v725_v3  ;;  %v569_v16 = vld [vmem:[#allocation3] sm:$0xf]  ;;  %v696_v17 = vld [vmem:[#allocation3 + $0x4] sm:$0xf0]  ;;  %v695_v20 = vld [vmem:[#allocation3 + $0x4] sm:$0xf] }
  0x13   :  { %v601_v18 = vld [vmem:[#allocation3 + $0x40] sm:$0xf]  ;;  %v704_v19 = vld [vmem:[#allocation3 + $0x44] sm:$0xf0]  ;;  %v571_v21 = vld [vmem:[#allocation3 + $0x8] sm:$0xf0]  ;;  %v570_v24 = vor.u32 %v696_v17, %v569_v16 }
  0x14   :  { %v703_v22 = vld [vmem:[#allocation3 + $0x44] sm:$0xf]  ;;  %v603_v23 = vld [vmem:[#allocation3 + $0x48] sm:$0xf0]  ;;  %v602_v25 = vor.u32 %v704_v19, %v601_v18  ;;  %v574_v26 = vor.u32 %v695_v20, %v571_v21  ;;  %v698_v29 = vld [vmem:[#allocation3 + $0x14] sm:$0xf0] }
  0x15   :  { %312 = vmatpush.bf16.msra.mxu0 %v716_v4  ;;  %776 = vmatpush.bf16.msra.mxu2 %v716_v4  ;;  %v606_v27 = vor.u32 %v703_v22, %v603_v23  ;;  %v609_v30 = vld [vmem:[#allocation3 + $0x50] sm:$0xf]  ;;  %v706_v31 = vld [vmem:[#allocation3 + $0x54] sm:$0xf0]  ;;  %v697_v32 = vld [vmem:[#allocation3 + $0x14] sm:$0xf]  ;;  %v578_v36 = vor.u32 %v698_v29, %v577_v28 }
  0x16   :  { %361 = vmatpush.bf16.msra.mxu1 %v724_v5  ;;  %784 = vmatpush.bf16.msra.mxu3 %v724_v5  ;;  %v579_v33 = vld [vmem:[#allocation3 + $0x18] sm:$0xf0]  ;;  %v705_v34 = vld [vmem:[#allocation3 + $0x54] sm:$0xf]  ;;  %v610_v37 = vor.u32 %v706_v31, %v609_v30  ;;  %v585_v40 = vld [vmem:[#allocation3 + $0x20] sm:$0xf] }
  0x17   :  { %v611_v35 = vld [vmem:[#allocation3 + $0x58] sm:$0xf0]  ;;  %v582_v38 = vor.u32 %v697_v32, %v579_v33  ;;  %v700_v41 = vld [vmem:[#allocation3 + $0x24] sm:$0xf0]  ;;  %v617_v42 = vld [vmem:[#allocation3 + $0x60] sm:$0xf] }
  0x18   :  { %v614_v39 = vor.u32 %v705_v34, %v611_v35  ;;  %v708_v43 = vld [vmem:[#allocation3 + $0x64] sm:$0xf0]  ;;  %v699_v44 = vld [vmem:[#allocation3 + $0x24] sm:$0xf]  ;;  %v587_v45 = vld [vmem:[#allocation3 + $0x28] sm:$0xf0]  ;;  %v586_v48 = vor.u32 %v700_v41, %v585_v40 }
  0x19   :  { %313 = vmatpush.bf16.msra.mxu0 %v715_v6  ;;  %777 = vmatpush.bf16.msra.mxu2 %v715_v6  ;;  %v707_v46 = vld [vmem:[#allocation3 + $0x64] sm:$0xf]  ;;  %v619_v47 = vld [vmem:[#allocation3 + $0x68] sm:$0xf0]  ;;  %v618_v49 = vor.u32 %v708_v43, %v617_v42  ;;  %v590_v50 = vor.u32 %v699_v44, %v587_v45  ;;  %v593_v52 = vld [vmem:[#allocation3 + $0x30] sm:$0xf] }
  0x1a   :  { %362 = vmatpush.bf16.msra.mxu1 %v723_v7  ;;  %785 = vmatpush.bf16.msra.mxu3 %v723_v7  ;;  %v622_v51 = vor.u32 %v707_v46, %v619_v47  ;;  %v702_v53 = vld [vmem:[#allocation3 + $0x34] sm:$0xf0]  ;;  %v625_v54 = vld [vmem:[#allocation3 + $0x70] sm:$0xf]  ;;  %v701_v56 = vld [vmem:[#allocation3 + $0x34] sm:$0xf] }
  0x1b   :  { %v710_v55 = vld [vmem:[#allocation3 + $0x74] sm:$0xf0]  ;;  %v595_v57 = vld [vmem:[#allocation3 + $0x38] sm:$0xf0]  ;;  %v709_v58 = vld [vmem:[#allocation3 + $0x74] sm:$0xf]  ;;  %v594_v60 = vor.u32 %v702_v53, %v593_v52 }
  0x1c   :  { %v627_v59 = vld [vmem:[#allocation3 + $0x78] sm:$0xf0]  ;;  %v626_v61 = vor.u32 %v710_v55, %v625_v54  ;;  %v598_v62 = vor.u32 %v701_v56, %v595_v57  ;;  %v921_v3 = vld [vmem:[%s968_s2] ss:$0 sm:$0xff]  ;;  %s883_s2 = smov [#allocation8]  }
  0x1d   :  { %314 = vmatpush.bf16.msra.mxu0 %v714_v8  ;;  %778 = vmatpush.bf16.msra.mxu2 %v714_v8  ;;  %v630_v63 = vor.u32 %v709_v58, %v627_v59  ;;  %v927_v7 = vld [vmem:[%s969_s3] ss:$0 sm:$0xff]  ;;  %s551_s3 = sshll.u32 %s883_s2, 4  ;;  %s552_s3 = int_to_ptr.vmem [resolvable:$true] %s551_s3 }
  0x1e   :  { %363 = vmatpush.bf16.msra.mxu1 %v722_v9  ;;  %786 = vmatpush.bf16.msra.mxu3 %v722_v9 }
  0x21   :  { %315 = vmatpush.bf16.msra.mxu0 %v713_v10  ;;  %779 = vmatpush.bf16.msra.mxu2 %v713_v10 }
  0x22   :  { %364 = vmatpush.bf16.msra.mxu1 %v721_v11  ;;  %787 = vmatpush.bf16.msra.mxu3 %v721_v11 }
  0x25   :  { %316 = vmatpush.bf16.msra.mxu0 %v712_v12  ;;  %780 = vmatpush.bf16.msra.mxu2 %v712_v12 }
  0x26   :  { %365 = vmatpush.bf16.msra.mxu1 %v720_v13  ;;  %788 = vmatpush.bf16.msra.mxu3 %v720_v13 }
  0x29   :  { %317 = vmatpush.bf16.msra.mxu0 %v711_v14  ;;  %781 = vmatpush.bf16.msra.mxu2 %v711_v14 }
  0x2a   :  { %366 = vmatpush.bf16.msra.mxu1 %v719_v15  ;;  %789 = vmatpush.bf16.msra.mxu3 %v719_v15 }
  0x2c   :  { %318 = vmatmul.bf16.vlgmr.msra.gmra.mxu0 %v570_v24  ;;  %338 = vmatmul.bf16.vlgmr.msra.gmra.mxu2 %v602_v25 }
  0x2d   :  { %367 = vmatmul.bf16.vlgmr.msra.gmra.mxu1 %v574_v26  ;;  %387 = vmatmul.bf16.vlgmr.msra.gmra.mxu3 %v606_v27 }
  0x3c   :  { %323 = vmatmul.bf16.gmra.mxu0 %v578_v36  ;;  %343 = vmatmul.bf16.gmra.mxu2 %v610_v37 }
  0x3d   :  { %372 = vmatmul.bf16.gmra.mxu1 %v582_v38  ;;  %392 = vmatmul.bf16.gmra.mxu3 %v614_v39 }
  0x4c   :  { %328 = vmatmul.bf16.gmra.mxu0 %v586_v48  ;;  %348 = vmatmul.bf16.gmra.mxu2 %v618_v49 }
  0x4d   :  { %377 = vmatmul.bf16.gmra.mxu1 %v590_v50  ;;  %397 = vmatmul.bf16.gmra.mxu3 %v622_v51 }
  0x5c   :  { %333 = vmatmul.bf16.gmra.mxu0 %v594_v60  ;;  %353 = vmatmul.bf16.gmra.mxu2 %v626_v61 }
  0x5d   :  { %382 = vmatmul.bf16.gmra.mxu1 %v598_v62  ;;  %402 = vmatmul.bf16.gmra.mxu3 %v630_v63 }
  0xa9   :  { %v319_v0 = vpop.f32.mrf.mxu0 }
  0xaa   :  { %v368_v1 = vpop.f32.mrf.mxu1 }
  0xab   :  { %v369_v2 = vadd.f32 %v368_v1, %v319_v0 }
  0xad   :  { %v463_v6 = vmul.f32 %v921_v3, %v369_v2 }
  0xaf   :  { %v339_v4 = vpop.f32.mrf.mxu2  ;;  %v483_v12 = vadd.f32 %v927_v7, %v463_v6 }
  0xb0   :  { %v388_v5 = vpop.f32.mrf.mxu3 }
  0xb1   :  { %v321_v8 = vpop.f32.mrf.mxu0  ;;  %v389_v10 = vadd.f32 %v388_v5, %v339_v4  ;;  %v499_v18 = vmax.f32 %v483_v12, 0.0 }
  0xb2   :  { %v370_v9 = vpop.f32.mrf.mxu1 }
  0xb3   :  { %v371_v11 = vadd.f32 %v370_v9, %v321_v8  ;;  %v471_v14 = vmul.f32 %v921_v3, %v389_v10 }
  0xb5   :  { %v464_v13 = vmul.f32 %v921_v3, %v371_v11  ;;  %v491_v23 = vadd.f32 %v927_v7, %v471_v14 }
  0xb7   :  { %v484_v15 = vadd.f32 %v927_v7, %v464_v13  ;;  %v341_v16 = vpop.f32.mrf.mxu2  ;;  %v507_v28 = vmax.f32 %v491_v23, 0.0 }
  0xb8   :  { %v390_v17 = vpop.f32.mrf.mxu3 }
  0xb9   :  { %v500_v19 = vmax.f32 %v484_v15, 0.0  ;;  %v391_v20 = vadd.f32 %v390_v17, %v341_v16  ;;  %v324_v21 = vpop.f32.mrf.mxu0 }
  0xba   :  { %v373_v22 = vpop.f32.mrf.mxu1 }
  0xbb   :  { %v730_v24 = vpack.c.bf16 %v500_v19, %v499_v18  ;;  %v472_v25 = vmul.f32 %v921_v3, %v391_v20  ;;  %v374_v27 = vadd.f32 %v373_v22, %v324_v21 }
  0xbd   :  { %731 = vst [vmem:[#allocation8] sm:$0xff] %v730_v24   ;;  %v492_v26 = vadd.f32 %v927_v7, %v472_v25  ;;  %v465_v33 = vmul.f32 %v921_v3, %v374_v27 }
  0xbf   :  { %v508_v29 = vmax.f32 %v492_v26, 0.0  ;;  %v344_v30 = vpop.f32.mrf.mxu2  ;;  %v485_v38 = vadd.f32 %v927_v7, %v465_v33 }
  0xc0   :  { %v393_v31 = vpop.f32.mrf.mxu3 }
  0xc1   :  { %v750_v32 = vpack.c.bf16 %v508_v29, %v507_v28  ;;  %v326_v34 = vpop.f32.mrf.mxu0  ;;  %v394_v36 = vadd.f32 %v393_v31, %v344_v30  ;;  %v501_v44 = vmax.f32 %v485_v38, 0.0 }
  0xc2   :  { %v375_v35 = vpop.f32.mrf.mxu1 }
  0xc3   :  { %770 = vst [vmem:[#allocation8 + $0x20] sm:$0xff] %v750_v32   ;;  %v376_v37 = vadd.f32 %v375_v35, %v326_v34  ;;  %v473_v40 = vmul.f32 %v921_v3, %v394_v36 }
  0xc5   :  { %v466_v39 = vmul.f32 %v921_v3, %v376_v37  ;;  %v493_v49 = vadd.f32 %v927_v7, %v473_v40 }
  0xc7   :  { %v486_v41 = vadd.f32 %v927_v7, %v466_v39  ;;  %v346_v42 = vpop.f32.mrf.mxu2  ;;  %v509_v54 = vmax.f32 %v493_v49, 0.0 }
  0xc8   :  { %v395_v43 = vpop.f32.mrf.mxu3 }
  0xc9   :  { %v502_v45 = vmax.f32 %v486_v41, 0.0  ;;  %v396_v46 = vadd.f32 %v395_v43, %v346_v42  ;;  %v329_v47 = vpop.f32.mrf.mxu0 }
  0xca   :  { %v378_v48 = vpop.f32.mrf.mxu1 }
  0xcb   :  { %v735_v50 = vpack.c.bf16 %v502_v45, %v501_v44  ;;  %v474_v51 = vmul.f32 %v921_v3, %v396_v46  ;;  %v379_v53 = vadd.f32 %v378_v48, %v329_v47 }
  0xcd   :  { %767 = vst [vmem:[#allocation8 + $0x8] sm:$0xff] %v735_v50   ;;  %v494_v52 = vadd.f32 %v927_v7, %v474_v51  ;;  %v467_v59 = vmul.f32 %v921_v3, %v379_v53 }
  0xcf   :  { %v510_v55 = vmax.f32 %v494_v52, 0.0  ;;  %v349_v56 = vpop.f32.mrf.mxu2  ;;  %v487_v0 = vadd.f32 %v927_v7, %v467_v59 }
  0xd0   :  { %v398_v57 = vpop.f32.mrf.mxu3 }
  0xd1   :  { %v755_v58 = vpack.c.bf16 %v510_v55, %v509_v54  ;;  %v331_v60 = vpop.f32.mrf.mxu0  ;;  %v399_v62 = vadd.f32 %v398_v57, %v349_v56  ;;  %v503_v8 = vmax.f32 %v487_v0, 0.0 }
  0xd2   :  { %v380_v61 = vpop.f32.mrf.mxu1 }
  0xd3   :  { %771 = vst [vmem:[#allocation8 + $0x28] sm:$0xff] %v755_v58   ;;  %v381_v63 = vadd.f32 %v380_v61, %v331_v60  ;;  %v475_v2 = vmul.f32 %v921_v3, %v399_v62 }
  0xd5   :  { %v468_v1 = vmul.f32 %v921_v3, %v381_v63  ;;  %v495_v13 = vadd.f32 %v927_v7, %v475_v2 }
  0xd7   :  { %v488_v4 = vadd.f32 %v927_v7, %v468_v1  ;;  %v351_v5 = vpop.f32.mrf.mxu2  ;;  %v511_v18 = vmax.f32 %v495_v13, 0.0 }
  0xd8   :  { %v400_v6 = vpop.f32.mrf.mxu3 }
  0xd9   :  { %v504_v9 = vmax.f32 %v488_v4, 0.0  ;;  %v401_v10 = vadd.f32 %v400_v6, %v351_v5  ;;  %v334_v11 = vpop.f32.mrf.mxu0 }
  0xda   :  { %v383_v12 = vpop.f32.mrf.mxu1 }
  0xdb   :  { %v740_v14 = vpack.c.bf16 %v504_v9, %v503_v8  ;;  %v476_v15 = vmul.f32 %v921_v3, %v401_v10  ;;  %v384_v17 = vadd.f32 %v383_v12, %v334_v11 }
  0xdd   :  { %768 = vst [vmem:[#allocation8 + $0x10] sm:$0xff] %v740_v14   ;;  %v496_v16 = vadd.f32 %v927_v7, %v476_v15  ;;  %v469_v23 = vmul.f32 %v921_v3, %v384_v17 }
  0xdf   :  { %v512_v19 = vmax.f32 %v496_v16, 0.0  ;;  %v354_v20 = vpop.f32.mrf.mxu2  ;;  %v489_v28 = vadd.f32 %v927_v7, %v469_v23 }
  0xe0   :  { %v403_v21 = vpop.f32.mrf.mxu3 }
  0xe1   :  { %v760_v22 = vpack.c.bf16 %v512_v19, %v511_v18  ;;  %v336_v24 = vpop.f32.mrf.mxu0  ;;  %v404_v26 = vadd.f32 %v403_v21, %v354_v20  ;;  %v505_v34 = vmax.f32 %v489_v28, 0.0 }
  0xe2   :  { %v385_v25 = vpop.f32.mrf.mxu1 }
  0xe3   :  { %772 = vst [vmem:[#allocation8 + $0x30] sm:$0xff] %v760_v22   ;;  %v386_v27 = vadd.f32 %v385_v25, %v336_v24  ;;  %v477_v30 = vmul.f32 %v921_v3, %v404_v26 }
  0xe5   :  { %v470_v29 = vmul.f32 %v921_v3, %v386_v27  ;;  %v497_v37 = vadd.f32 %v927_v7, %v477_v30 }
  0xe7   :  { %v490_v31 = vadd.f32 %v927_v7, %v470_v29  ;;  %v356_v32 = vpop.f32.mrf.mxu2  ;;  %v513_v41 = vmax.f32 %v497_v37, 0.0 }
  0xe8   :  { %v405_v33 = vpop.f32.mrf.mxu3 }
  0xe9   :  { %v506_v35 = vmax.f32 %v490_v31, 0.0  ;;  %v406_v36 = vadd.f32 %v405_v33, %v356_v32 }
  0xeb   :  { %v745_v38 = vpack.c.bf16 %v506_v35, %v505_v34  ;;  %v478_v39 = vmul.f32 %v921_v3, %v406_v36 }
  0xed   :  { %769 = vst [vmem:[#allocation8 + $0x18] sm:$0xff] %v745_v38   ;;  %v498_v40 = vadd.f32 %v927_v7, %v478_v39 }
  0xef   :  { %v514_v42 = vmax.f32 %v498_v40, 0.0 }
  0xf1   :  { %v765_v43 = vpack.c.bf16 %v514_v42, %v513_v41 }
  0xf3   :  { %773 = vst [vmem:[#allocation8 + $0x38] sm:$0xff] %v765_v43  }
  0xf4   :  { %559 = dma.vmem_to_hbm [thread:$0]  %s552_s3, 1024, %s554_s7, [#allocation5], %s881_s27, %s881_s27, %s882_s28  }
  0xf5   :  { %875 = dma.done.wait [#allocation5], 1024  }
  0xf6   :  { %876 = vsyncadd [#allocation5], 4294966272 }
  0xf7   :  { %564 = vsyncpa [#allocation4], 1 }
  0xf8   :  { %565 = vsyncpa [#allocation7], 1 }
  0xf9   :  { %566 = vsyncpa [#allocation5], 1 }

</bundles_post_ra>
